<compile_context>
chip_gen: v6e
topology: v6e:2x2x1
jax: 0.10.0
libtpu: 0.0.40
codegen_flags: <defaults>
</compile_context>

<pallas_src>
import functools

import jax
import jax.numpy as jnp
from jax import lax
from jax.experimental import pallas as pl
from jax.experimental.pallas import tpu as pltpu


def _distri_kernel(adv_ref, p1_ref, p2_ref, ps_ref, *, gb, c, ch):
    """One (batch-group, point-tile) grid step.

    Block shapes:
      adv/p1/p2 : (gb*c, S, 128)     input dtype (f32 / bf16 / f16)
      ps        : (1, 1, 2, ch, 128) float32 — partial SSE for both MSE terms.
    """
    s_total = adv_ref.shape[1]
    n_chunks = s_total // ch
    f32 = jnp.float32

    def chunk_body(ci, carry):
        acc1, acc2 = carry
        s0 = pl.multiple_of(ci * ch, ch)
        rows = pl.ds(s0, ch)
        for b in range(gb):                      # static unroll (gb is small)
            # Explicit channel accumulation: six running (ch,128) sums, never a
            # (C, S, 128) product temporary.  Pure VALU mul+add chain.
            dot12 = jnp.zeros((ch, 128), f32)
            dot1a = jnp.zeros((ch, 128), f32)
            dot2a = jnp.zeros((ch, 128), f32)
            sq1 = jnp.zeros((ch, 128), f32)
            sq2 = jnp.zeros((ch, 128), f32)
            sqa = jnp.zeros((ch, 128), f32)
            for k in range(c):                   # static unroll (C is tiny)
                r = b * c + k
                a = adv_ref[r, rows, :].astype(f32)   # per-chunk upcast only
                x1 = p1_ref[r, rows, :].astype(f32)
                x2 = p2_ref[r, rows, :].astype(f32)
                dot12 = dot12 + x1 * x2
                dot1a = dot1a + x1 * a
                dot2a = dot2a + x2 * a
                sq1 = sq1 + x1 * x1
                sq2 = sq2 + x2 * x2
                sqa = sqa + a * a

            # rsqrt on the EUP replaces sqrt + divide on the VPU.  All-zero
            # channel vectors give inf/NaN, matching the PyTorch divide-by-0.
            inv1 = lax.rsqrt(sq1)
            inv2 = lax.rsqrt(sq2)
            inva = lax.rsqrt(sqa)

            similar = jnp.abs(dot12 * (inv1 * inv2))
            sim_adv_1 = jnp.abs(dot1a * (inv1 * inva))
            sim_adv_2 = jnp.abs(dot2a * (inv2 * inva))

            d1 = similar - sim_adv_1
            d2 = similar - sim_adv_2
            acc1 = acc1 + d1 * d1
            acc2 = acc2 + d2 * d2
        return acc1, acc2

    init = (jnp.zeros((ch, 128), f32), jnp.zeros((ch, 128), f32))
    acc1, acc2 = lax.fori_loop(0, n_chunks, chunk_body, init,
                               unroll=min(n_chunks, 8))

    # Lane-dense partials; no in-kernel cross-lane/sublane reduce at all.
    ps_ref[0, 0, 0, :, :] = acc1
    ps_ref[0, 0, 1, :, :] = acc2


def _vmem_budget_bytes():
    """Generation-aware budget for double-buffered input blocks."""
    physical = 64 << 20
    try:
        physical = int(getattr(pltpu.get_tpu_info(), "vmem_capacity_bytes",
                               physical))
    except Exception:
        pass
    # v7x-class (64 MiB physical / 32 MiB scoped default): stay at 24 MiB.
    # v5e / v6e (128 MiB physical): allow much fatter tiles.
    return (24 << 20) if physical <= (64 << 20) else (64 << 20)


def _largest_divisor_leq(n, cap):
    cap = max(1, min(n, cap))
    for d in range(cap, 0, -1):
        if n % d == 0:
            return d
    return 1


def _pick_point_tile(n_points, cap_points, granule):
    # Prefer >= 2 point tiles so a v7x chip's two TensorCores can each take a
    # share of this memory-bound kernel; one extra grid step is ~0.35 us on
    # single-TC chips, i.e. noise.
    target = min(cap_points, n_points)
    if n_points >= 2 * granule:
        target = min(target, n_points // 2)
    target = max(granule, (target // granule) * granule)
    best = granule
    t = granule
    while t <= target:
        if n_points % t == 0:
            best = t
        t += granule
    return best


def distri_loss(adv_data, aug_pc1_data, aug_pc2_data, *, point_tile=None):
    """Pallas implementation of DistriLoss.forward.  Inputs: (B, C, N)."""
    B, C, N = adv_data.shape
    assert aug_pc1_data.shape == (B, C, N) and aug_pc2_data.shape == (B, C, N)
    f32 = jnp.float32

    # Stream narrow dtypes straight through the DMA (upcast happens per-chunk
    # inside the kernel); fall back to a wrapper f32 cast only for
    # unsupported / mismatched dtypes.
    streamable = (jnp.float32, jnp.bfloat16, jnp.float16)
    same = (adv_data.dtype == aug_pc1_data.dtype == aug_pc2_data.dtype)
    if not (same and any(adv_data.dtype == d for d in streamable)):
        adv_data = adv_data.astype(f32)
        aug_pc1_data = aug_pc1_data.astype(f32)
        aug_pc2_data = aug_pc2_data.astype(f32)
    dtype = adv_data.dtype
    itemsize = jnp.dtype(dtype).itemsize

    # Sub-32-bit dtypes pack 2 rows per sublane: keep chunk / tile granularity
    # at a full packed-sublane group of points.
    ch = 8 if itemsize == 4 else 16
    granule = ch * 128
    # TODO(synk): ragged N (not a multiple of the granule) needs a padded /
    # masked last tile; not implemented here.
    assert N % granule == 0, (
        f"point dim must be a multiple of {granule} for dtype {dtype}")

    budget = _vmem_budget_bytes()

    # Tile the batch axis only if B*C alone would blow the budget at the
    # minimum point tile (channels of one sample always stay in one block).
    bytes_per_batch_min = 2 * 3 * C * granule * itemsize  # dbl-buffered, 3 inputs
    gb = _largest_divisor_leq(B, max(1, budget // bytes_per_batch_min))
    grid_b = B // gb

    cap_points = max(granule, budget // (2 * 3 * gb * C * itemsize))
    if point_tile is None:
        point_tile = _pick_point_tile(N, cap_points, granule)
    assert point_tile % granule == 0 and N % point_tile == 0, (
        "point tile must be a granule multiple that divides N")
    s = point_tile // 128
    grid_n = N // point_tile

    # Free, layout-preserving reshape: (B, C, N) -> (B*C, N/128, 128) so every
    # block is lane-dense and the channel reduction is a leading-axis sum.
    def prep(x):
        return x.reshape(B * C, N // 128, 128)

    adv = prep(adv_data)
    p1 = prep(aug_pc1_data)
    p2 = prep(aug_pc2_data)

    in_spec = pl.BlockSpec((gb * C, s, 128), lambda g, i: (g, i, 0))
    out_spec = pl.BlockSpec((1, 1, 2, ch, 128), lambda g, i: (g, i, 0, 0, 0))
    out_shape = jax.ShapeDtypeStruct((grid_b, grid_n, 2, ch, 128), f32)

    need = 2 * 3 * gb * C * point_tile * itemsize + 2 * 2 * ch * 128 * 4
    vmem_limit = int(max(need + (2 << 20), 16 << 20))   # always >= need

    partials = pl.pallas_call(
        functools.partial(_distri_kernel, gb=gb, c=C, ch=ch),
        out_shape=out_shape,
        grid_spec=pltpu.PrefetchScalarGridSpec(
            num_scalar_prefetch=0,
            grid=(grid_b, grid_n),
            in_specs=[in_spec, in_spec, in_spec],
            out_specs=out_spec,
        ),
        compiler_params=pltpu.CompilerParams(
            # TODO(synk): try pltpu.CORE_PARALLEL / pl.core_map for explicit
            # dual-TC sharding on v7x; plain "parallel" kept for portability.
            dimension_semantics=("parallel", "parallel"),
            vmem_limit_bytes=vmem_limit,
        ),
    )(adv, p1, p2)

    # nn.MSELoss() == mean over all (B, N) elements.  Partials are exact f32
    # per-(batch-group, point-tile) sums over their (sublane, lane) slots.
    # TODO(synk): for tiny single-step problems the two sums + sigmoid could be
    # fused in-kernel via SMEM scalar outputs to drop these epilogue HLOs.
    sums = jnp.sum(partials, axis=(0, 1, 3, 4))          # (2,)
    denom = jnp.float32(B * N)
    mse1 = sums[0] / denom
    mse2 = sums[1] / denom
    # Reproduce the (asymmetric) PyTorch formula exactly; .mean() of a scalar.
    return 1.0 / (jax.nn.sigmoid(mse1) + 1.0 / jax.nn.sigmoid(mse2))


def _distri_loss_ref(adv, p1, p2):
    """Pure-JAX reference mirroring the PyTorch forward."""
    sim = jnp.abs(jnp.sum(p1 * p2, axis=1) /
                  (jnp.sqrt(jnp.sum(p1 ** 2, axis=1)) *
                   jnp.sqrt(jnp.sum(p2 ** 2, axis=1))))
    s1 = jnp.abs(jnp.sum(p1 * adv, axis=1) /
                 (jnp.sqrt(jnp.sum(p1 ** 2, axis=1)) *
                  jnp.sqrt(jnp.sum(adv ** 2, axis=1))))
    s2 = jnp.abs(jnp.sum(p2 * adv, axis=1) /
                 (jnp.sqrt(jnp.sum(p2 ** 2, axis=1)) *
                  jnp.sqrt(jnp.sum(adv ** 2, axis=1))))
    mse1 = jnp.mean((sim - s1) ** 2)
    mse2 = jnp.mean((sim - s2) ** 2)
    return 1.0 / (jax.nn.sigmoid(mse1) + 1.0 / jax.nn.sigmoid(mse2))


if __name__ == "__main__":
    # DistriLoss has no learnable parameters — nothing to initialize.
    key = jax.random.PRNGKey(0)
    k1, k2, k3 = jax.random.split(key, 3)
    B, C, N = 2, 3, 4096  # (batch, xyz, num_points) — small point-cloud shape

    adv = jax.random.normal(k1, (B, C, N), dtype=jnp.float32)
    pc1 = jax.random.normal(k2, (B, C, N), dtype=jnp.float32)
    pc2 = jax.random.normal(k3, (B, C, N), dtype=jnp.float32)

    ref = jax.block_until_ready(_distri_loss_ref(adv, pc1, pc2))

    # Auto-picked tiles (2 point tiles of 2048 -> dual-TC friendly).
    out_auto = jax.block_until_ready(distri_loss(adv, pc1, pc2))
    # Manual smaller tile exercises a 4-step grid through the same code path.
    out_tiled = jax.block_until_ready(distri_loss(adv, pc1, pc2, point_tile=1024))

    assert jnp.allclose(out_auto, ref, rtol=1e-4, atol=1e-5), (out_auto, ref)
    assert jnp.allclose(out_tiled, ref, rtol=1e-4, atol=1e-5), (out_tiled, ref)

    # bf16 streaming path: no wrapper upcast, per-chunk upcast inside the kernel.
    adv16 = adv.astype(jnp.bfloat16)
    pc116 = pc1.astype(jnp.bfloat16)
    pc216 = pc2.astype(jnp.bfloat16)
    ref16 = jax.block_until_ready(_distri_loss_ref(
        adv16.astype(jnp.float32), pc116.astype(jnp.float32),
        pc216.astype(jnp.float32)))
    out16 = jax.block_until_ready(distri_loss(adv16, pc116, pc216))
    assert jnp.allclose(out16, ref16, rtol=1e-3, atol=1e-4), (out16, ref16)

    print("KERNEL_OK")
</pallas_src>

<mosaic_0001>
module attributes {stable_mosaic.version = 11 : i64} {
  func.func @_distri_kernel(%arg0: i32, %arg1: i32, %arg2: memref<6x16x128xf32, #tpu.memory_space<vmem>>, %arg3: memref<6x16x128xf32, #tpu.memory_space<vmem>>, %arg4: memref<6x16x128xf32, #tpu.memory_space<vmem>>, %arg5: memref<1x1x2x8x128xf32, #tpu.memory_space<vmem>>) attributes {dimension_semantics = [#tpu.dimension_semantics<parallel>, #tpu.dimension_semantics<parallel>], iteration_bounds = array<i64: 1, 2>, scalar_prefetch = 0 : i64, scratch_operands = 0 : i64, tpu.core_type = #tpu.core_type<tc>, window_params = [{transform_indices = @transform_0, window_bounds = array<i64: 6, 16, 128>}, {transform_indices = @transform_1, window_bounds = array<i64: 6, 16, 128>}, {transform_indices = @transform_2, window_bounds = array<i64: 6, 16, 128>}, {transform_indices = @transform_3, window_bounds = array<i64: 1, 1, 2, 8, 128>}]} {
    %cst = arith.constant 0.000000e+00 : f32
    %0 = vector.broadcast %cst : f32 to vector<8x128xf32>
    %cst_0 = arith.constant 0.000000e+00 : f32
    %1 = vector.broadcast %cst_0 : f32 to vector<8x128xf32>
    %c0_i32 = arith.constant 0 : i32
    %c8_i32 = arith.constant 8 : i32
    %2 = arith.muli %c0_i32, %c8_i32 : i32
    %3 = tpu.assume_multiple %2, 8 : i32
    %cst_1 = arith.constant 0.000000e+00 : f32
    %4 = vector.broadcast %cst_1 : f32 to vector<8x128xf32>
    %cst_2 = arith.constant 0.000000e+00 : f32
    %5 = vector.broadcast %cst_2 : f32 to vector<8x128xf32>
    %cst_3 = arith.constant 0.000000e+00 : f32
    %6 = vector.broadcast %cst_3 : f32 to vector<8x128xf32>
    %cst_4 = arith.constant 0.000000e+00 : f32
    %7 = vector.broadcast %cst_4 : f32 to vector<8x128xf32>
    %cst_5 = arith.constant 0.000000e+00 : f32
    %8 = vector.broadcast %cst_5 : f32 to vector<8x128xf32>
    %cst_6 = arith.constant 0.000000e+00 : f32
    %9 = vector.broadcast %cst_6 : f32 to vector<8x128xf32>
    %c0 = arith.constant 0 : index
    %10 = arith.index_cast %3 : i32 to index
    %c0_7 = arith.constant 0 : index
    %11 = vector.load %arg2[%c0, %10, %c0_7] : memref<6x16x128xf32, #tpu.memory_space<vmem>>, vector<1x8x128xf32>
    %12 = vector.shape_cast %11 : vector<1x8x128xf32> to vector<8x128xf32>
    %c0_8 = arith.constant 0 : index
    %13 = arith.index_cast %3 : i32 to index
    %c0_9 = arith.constant 0 : index
    %14 = vector.load %arg3[%c0_8, %13, %c0_9] : memref<6x16x128xf32, #tpu.memory_space<vmem>>, vector<1x8x128xf32>
    %15 = vector.shape_cast %14 : vector<1x8x128xf32> to vector<8x128xf32>
    %c0_10 = arith.constant 0 : index
    %16 = arith.index_cast %3 : i32 to index
    %c0_11 = arith.constant 0 : index
    %17 = vector.load %arg4[%c0_10, %16, %c0_11] : memref<6x16x128xf32, #tpu.memory_space<vmem>>, vector<1x8x128xf32>
    %18 = vector.shape_cast %17 : vector<1x8x128xf32> to vector<8x128xf32>
    %19 = arith.mulf %15, %18 : vector<8x128xf32>
    %20 = arith.addf %4, %19 : vector<8x128xf32>
    %21 = arith.mulf %15, %12 : vector<8x128xf32>
    %22 = arith.addf %5, %21 : vector<8x128xf32>
    %23 = arith.mulf %18, %12 : vector<8x128xf32>
    %24 = arith.addf %6, %23 : vector<8x128xf32>
    %25 = arith.mulf %15, %15 : vector<8x128xf32>
    %26 = arith.addf %7, %25 : vector<8x128xf32>
    %27 = arith.mulf %18, %18 : vector<8x128xf32>
    %28 = arith.addf %8, %27 : vector<8x128xf32>
    %29 = arith.mulf %12, %12 : vector<8x128xf32>
    %30 = arith.addf %9, %29 : vector<8x128xf32>
    %c1 = arith.constant 1 : index
    %31 = arith.index_cast %3 : i32 to index
    %c0_12 = arith.constant 0 : index
    %32 = vector.load %arg2[%c1, %31, %c0_12] : memref<6x16x128xf32, #tpu.memory_space<vmem>>, vector<1x8x128xf32>
    %33 = vector.shape_cast %32 : vector<1x8x128xf32> to vector<8x128xf32>
    %c1_13 = arith.constant 1 : index
    %34 = arith.index_cast %3 : i32 to index
    %c0_14 = arith.constant 0 : index
    %35 = vector.load %arg3[%c1_13, %34, %c0_14] : memref<6x16x128xf32, #tpu.memory_space<vmem>>, vector<1x8x128xf32>
    %36 = vector.shape_cast %35 : vector<1x8x128xf32> to vector<8x128xf32>
    %c1_15 = arith.constant 1 : index
    %37 = arith.index_cast %3 : i32 to index
    %c0_16 = arith.constant 0 : index
    %38 = vector.load %arg4[%c1_15, %37, %c0_16] : memref<6x16x128xf32, #tpu.memory_space<vmem>>, vector<1x8x128xf32>
    %39 = vector.shape_cast %38 : vector<1x8x128xf32> to vector<8x128xf32>
    %40 = arith.mulf %36, %39 : vector<8x128xf32>
    %41 = arith.addf %20, %40 : vector<8x128xf32>
    %42 = arith.mulf %36, %33 : vector<8x128xf32>
    %43 = arith.addf %22, %42 : vector<8x128xf32>
    %44 = arith.mulf %39, %33 : vector<8x128xf32>
    %45 = arith.addf %24, %44 : vector<8x128xf32>
    %46 = arith.mulf %36, %36 : vector<8x128xf32>
    %47 = arith.addf %26, %46 : vector<8x128xf32>
    %48 = arith.mulf %39, %39 : vector<8x128xf32>
    %49 = arith.addf %28, %48 : vector<8x128xf32>
    %50 = arith.mulf %33, %33 : vector<8x128xf32>
    %51 = arith.addf %30, %50 : vector<8x128xf32>
    %c2 = arith.constant 2 : index
    %52 = arith.index_cast %3 : i32 to index
    %c0_17 = arith.constant 0 : index
    %53 = vector.load %arg2[%c2, %52, %c0_17] : memref<6x16x128xf32, #tpu.memory_space<vmem>>, vector<1x8x128xf32>
    %54 = vector.shape_cast %53 : vector<1x8x128xf32> to vector<8x128xf32>
    %c2_18 = arith.constant 2 : index
    %55 = arith.index_cast %3 : i32 to index
    %c0_19 = arith.constant 0 : index
    %56 = vector.load %arg3[%c2_18, %55, %c0_19] : memref<6x16x128xf32, #tpu.memory_space<vmem>>, vector<1x8x128xf32>
    %57 = vector.shape_cast %56 : vector<1x8x128xf32> to vector<8x128xf32>
    %c2_20 = arith.constant 2 : index
    %58 = arith.index_cast %3 : i32 to index
    %c0_21 = arith.constant 0 : index
    %59 = vector.load %arg4[%c2_20, %58, %c0_21] : memref<6x16x128xf32, #tpu.memory_space<vmem>>, vector<1x8x128xf32>
    %60 = vector.shape_cast %59 : vector<1x8x128xf32> to vector<8x128xf32>
    %61 = arith.mulf %57, %60 : vector<8x128xf32>
    %62 = arith.addf %41, %61 : vector<8x128xf32>
    %63 = arith.mulf %57, %54 : vector<8x128xf32>
    %64 = arith.addf %43, %63 : vector<8x128xf32>
    %65 = arith.mulf %60, %54 : vector<8x128xf32>
    %66 = arith.addf %45, %65 : vector<8x128xf32>
    %67 = arith.mulf %57, %57 : vector<8x128xf32>
    %68 = arith.addf %47, %67 : vector<8x128xf32>
    %69 = arith.mulf %60, %60 : vector<8x128xf32>
    %70 = arith.addf %49, %69 : vector<8x128xf32>
    %71 = arith.mulf %54, %54 : vector<8x128xf32>
    %72 = arith.addf %51, %71 : vector<8x128xf32>
    %73 = math.rsqrt %68 : vector<8x128xf32>
    %74 = math.rsqrt %70 : vector<8x128xf32>
    %75 = math.rsqrt %72 : vector<8x128xf32>
    %76 = arith.mulf %73, %74 : vector<8x128xf32>
    %77 = arith.mulf %62, %76 : vector<8x128xf32>
    %78 = math.absf %77 : vector<8x128xf32>
    %79 = arith.mulf %73, %75 : vector<8x128xf32>
    %80 = arith.mulf %64, %79 : vector<8x128xf32>
    %81 = math.absf %80 : vector<8x128xf32>
    %82 = arith.mulf %74, %75 : vector<8x128xf32>
    %83 = arith.mulf %66, %82 : vector<8x128xf32>
    %84 = math.absf %83 : vector<8x128xf32>
    %85 = arith.subf %78, %81 : vector<8x128xf32>
    %86 = arith.subf %78, %84 : vector<8x128xf32>
    %87 = arith.mulf %85, %85 : vector<8x128xf32>
    %88 = arith.addf %0, %87 : vector<8x128xf32>
    %89 = arith.mulf %86, %86 : vector<8x128xf32>
    %90 = arith.addf %1, %89 : vector<8x128xf32>
    %cst_22 = arith.constant 0.000000e+00 : f32
    %91 = vector.broadcast %cst_22 : f32 to vector<8x128xf32>
    %cst_23 = arith.constant 0.000000e+00 : f32
    %92 = vector.broadcast %cst_23 : f32 to vector<8x128xf32>
    %cst_24 = arith.constant 0.000000e+00 : f32
    %93 = vector.broadcast %cst_24 : f32 to vector<8x128xf32>
    %cst_25 = arith.constant 0.000000e+00 : f32
    %94 = vector.broadcast %cst_25 : f32 to vector<8x128xf32>
    %cst_26 = arith.constant 0.000000e+00 : f32
    %95 = vector.broadcast %cst_26 : f32 to vector<8x128xf32>
    %cst_27 = arith.constant 0.000000e+00 : f32
    %96 = vector.broadcast %cst_27 : f32 to vector<8x128xf32>
    %c3 = arith.constant 3 : index
    %97 = arith.index_cast %3 : i32 to index
    %c0_28 = arith.constant 0 : index
    %98 = vector.load %arg2[%c3, %97, %c0_28] : memref<6x16x128xf32, #tpu.memory_space<vmem>>, vector<1x8x128xf32>
    %99 = vector.shape_cast %98 : vector<1x8x128xf32> to vector<8x128xf32>
    %c3_29 = arith.constant 3 : index
    %100 = arith.index_cast %3 : i32 to index
    %c0_30 = arith.constant 0 : index
    %101 = vector.load %arg3[%c3_29, %100, %c0_30] : memref<6x16x128xf32, #tpu.memory_space<vmem>>, vector<1x8x128xf32>
    %102 = vector.shape_cast %101 : vector<1x8x128xf32> to vector<8x128xf32>
    %c3_31 = arith.constant 3 : index
    %103 = arith.index_cast %3 : i32 to index
    %c0_32 = arith.constant 0 : index
    %104 = vector.load %arg4[%c3_31, %103, %c0_32] : memref<6x16x128xf32, #tpu.memory_space<vmem>>, vector<1x8x128xf32>
    %105 = vector.shape_cast %104 : vector<1x8x128xf32> to vector<8x128xf32>
    %106 = arith.mulf %102, %105 : vector<8x128xf32>
    %107 = arith.addf %91, %106 : vector<8x128xf32>
    %108 = arith.mulf %102, %99 : vector<8x128xf32>
    %109 = arith.addf %92, %108 : vector<8x128xf32>
    %110 = arith.mulf %105, %99 : vector<8x128xf32>
    %111 = arith.addf %93, %110 : vector<8x128xf32>
    %112 = arith.mulf %102, %102 : vector<8x128xf32>
    %113 = arith.addf %94, %112 : vector<8x128xf32>
    %114 = arith.mulf %105, %105 : vector<8x128xf32>
    %115 = arith.addf %95, %114 : vector<8x128xf32>
    %116 = arith.mulf %99, %99 : vector<8x128xf32>
    %117 = arith.addf %96, %116 : vector<8x128xf32>
    %c4 = arith.constant 4 : index
    %118 = arith.index_cast %3 : i32 to index
    %c0_33 = arith.constant 0 : index
    %119 = vector.load %arg2[%c4, %118, %c0_33] : memref<6x16x128xf32, #tpu.memory_space<vmem>>, vector<1x8x128xf32>
    %120 = vector.shape_cast %119 : vector<1x8x128xf32> to vector<8x128xf32>
    %c4_34 = arith.constant 4 : index
    %121 = arith.index_cast %3 : i32 to index
    %c0_35 = arith.constant 0 : index
    %122 = vector.load %arg3[%c4_34, %121, %c0_35] : memref<6x16x128xf32, #tpu.memory_space<vmem>>, vector<1x8x128xf32>
    %123 = vector.shape_cast %122 : vector<1x8x128xf32> to vector<8x128xf32>
    %c4_36 = arith.constant 4 : index
    %124 = arith.index_cast %3 : i32 to index
    %c0_37 = arith.constant 0 : index
    %125 = vector.load %arg4[%c4_36, %124, %c0_37] : memref<6x16x128xf32, #tpu.memory_space<vmem>>, vector<1x8x128xf32>
    %126 = vector.shape_cast %125 : vector<1x8x128xf32> to vector<8x128xf32>
    %127 = arith.mulf %123, %126 : vector<8x128xf32>
    %128 = arith.addf %107, %127 : vector<8x128xf32>
    %129 = arith.mulf %123, %120 : vector<8x128xf32>
    %130 = arith.addf %109, %129 : vector<8x128xf32>
    %131 = arith.mulf %126, %120 : vector<8x128xf32>
    %132 = arith.addf %111, %131 : vector<8x128xf32>
    %133 = arith.mulf %123, %123 : vector<8x128xf32>
    %134 = arith.addf %113, %133 : vector<8x128xf32>
    %135 = arith.mulf %126, %126 : vector<8x128xf32>
    %136 = arith.addf %115, %135 : vector<8x128xf32>
    %137 = arith.mulf %120, %120 : vector<8x128xf32>
    %138 = arith.addf %117, %137 : vector<8x128xf32>
    %c5 = arith.constant 5 : index
    %139 = arith.index_cast %3 : i32 to index
    %c0_38 = arith.constant 0 : index
    %140 = vector.load %arg2[%c5, %139, %c0_38] : memref<6x16x128xf32, #tpu.memory_space<vmem>>, vector<1x8x128xf32>
    %141 = vector.shape_cast %140 : vector<1x8x128xf32> to vector<8x128xf32>
    %c5_39 = arith.constant 5 : index
    %142 = arith.index_cast %3 : i32 to index
    %c0_40 = arith.constant 0 : index
    %143 = vector.load %arg3[%c5_39, %142, %c0_40] : memref<6x16x128xf32, #tpu.memory_space<vmem>>, vector<1x8x128xf32>
    %144 = vector.shape_cast %143 : vector<1x8x128xf32> to vector<8x128xf32>
    %c5_41 = arith.constant 5 : index
    %145 = arith.index_cast %3 : i32 to index
    %c0_42 = arith.constant 0 : index
    %146 = vector.load %arg4[%c5_41, %145, %c0_42] : memref<6x16x128xf32, #tpu.memory_space<vmem>>, vector<1x8x128xf32>
    %147 = vector.shape_cast %146 : vector<1x8x128xf32> to vector<8x128xf32>
    %148 = arith.mulf %144, %147 : vector<8x128xf32>
    %149 = arith.addf %128, %148 : vector<8x128xf32>
    %150 = arith.mulf %144, %141 : vector<8x128xf32>
    %151 = arith.addf %130, %150 : vector<8x128xf32>
    %152 = arith.mulf %147, %141 : vector<8x128xf32>
    %153 = arith.addf %132, %152 : vector<8x128xf32>
    %154 = arith.mulf %144, %144 : vector<8x128xf32>
    %155 = arith.addf %134, %154 : vector<8x128xf32>
    %156 = arith.mulf %147, %147 : vector<8x128xf32>
    %157 = arith.addf %136, %156 : vector<8x128xf32>
    %158 = arith.mulf %141, %141 : vector<8x128xf32>
    %159 = arith.addf %138, %158 : vector<8x128xf32>
    %160 = math.rsqrt %155 : vector<8x128xf32>
    %161 = math.rsqrt %157 : vector<8x128xf32>
    %162 = math.rsqrt %159 : vector<8x128xf32>
    %163 = arith.mulf %160, %161 : vector<8x128xf32>
    %164 = arith.mulf %149, %163 : vector<8x128xf32>
    %165 = math.absf %164 : vector<8x128xf32>
    %166 = arith.mulf %160, %162 : vector<8x128xf32>
    %167 = arith.mulf %151, %166 : vector<8x128xf32>
    %168 = math.absf %167 : vector<8x128xf32>
    %169 = arith.mulf %161, %162 : vector<8x128xf32>
    %170 = arith.mulf %153, %169 : vector<8x128xf32>
    %171 = math.absf %170 : vector<8x128xf32>
    %172 = arith.subf %165, %168 : vector<8x128xf32>
    %173 = arith.subf %165, %171 : vector<8x128xf32>
    %174 = arith.mulf %172, %172 : vector<8x128xf32>
    %175 = arith.addf %88, %174 : vector<8x128xf32>
    %176 = arith.mulf %173, %173 : vector<8x128xf32>
    %177 = arith.addf %90, %176 : vector<8x128xf32>
    %c1_i32 = arith.constant 1 : i32
    %c8_i32_43 = arith.constant 8 : i32
    %178 = arith.muli %c1_i32, %c8_i32_43 : i32
    %179 = tpu.assume_multiple %178, 8 : i32
    %cst_44 = arith.constant 0.000000e+00 : f32
    %180 = vector.broadcast %cst_44 : f32 to vector<8x128xf32>
    %cst_45 = arith.constant 0.000000e+00 : f32
    %181 = vector.broadcast %cst_45 : f32 to vector<8x128xf32>
    %cst_46 = arith.constant 0.000000e+00 : f32
    %182 = vector.broadcast %cst_46 : f32 to vector<8x128xf32>
    %cst_47 = arith.constant 0.000000e+00 : f32
    %183 = vector.broadcast %cst_47 : f32 to vector<8x128xf32>
    %cst_48 = arith.constant 0.000000e+00 : f32
    %184 = vector.broadcast %cst_48 : f32 to vector<8x128xf32>
    %cst_49 = arith.constant 0.000000e+00 : f32
    %185 = vector.broadcast %cst_49 : f32 to vector<8x128xf32>
    %c0_50 = arith.constant 0 : index
    %186 = arith.index_cast %179 : i32 to index
    %c0_51 = arith.constant 0 : index
    %187 = vector.load %arg2[%c0_50, %186, %c0_51] : memref<6x16x128xf32, #tpu.memory_space<vmem>>, vector<1x8x128xf32>
    %188 = vector.shape_cast %187 : vector<1x8x128xf32> to vector<8x128xf32>
    %c0_52 = arith.constant 0 : index
    %189 = arith.index_cast %179 : i32 to index
    %c0_53 = arith.constant 0 : index
    %190 = vector.load %arg3[%c0_52, %189, %c0_53] : memref<6x16x128xf32, #tpu.memory_space<vmem>>, vector<1x8x128xf32>
    %191 = vector.shape_cast %190 : vector<1x8x128xf32> to vector<8x128xf32>
    %c0_54 = arith.constant 0 : index
    %192 = arith.index_cast %179 : i32 to index
    %c0_55 = arith.constant 0 : index
    %193 = vector.load %arg4[%c0_54, %192, %c0_55] : memref<6x16x128xf32, #tpu.memory_space<vmem>>, vector<1x8x128xf32>
    %194 = vector.shape_cast %193 : vector<1x8x128xf32> to vector<8x128xf32>
    %195 = arith.mulf %191, %194 : vector<8x128xf32>
    %196 = arith.addf %180, %195 : vector<8x128xf32>
    %197 = arith.mulf %191, %188 : vector<8x128xf32>
    %198 = arith.addf %181, %197 : vector<8x128xf32>
    %199 = arith.mulf %194, %188 : vector<8x128xf32>
    %200 = arith.addf %182, %199 : vector<8x128xf32>
    %201 = arith.mulf %191, %191 : vector<8x128xf32>
    %202 = arith.addf %183, %201 : vector<8x128xf32>
    %203 = arith.mulf %194, %194 : vector<8x128xf32>
    %204 = arith.addf %184, %203 : vector<8x128xf32>
    %205 = arith.mulf %188, %188 : vector<8x128xf32>
    %206 = arith.addf %185, %205 : vector<8x128xf32>
    %c1_56 = arith.constant 1 : index
    %207 = arith.index_cast %179 : i32 to index
    %c0_57 = arith.constant 0 : index
    %208 = vector.load %arg2[%c1_56, %207, %c0_57] : memref<6x16x128xf32, #tpu.memory_space<vmem>>, vector<1x8x128xf32>
    %209 = vector.shape_cast %208 : vector<1x8x128xf32> to vector<8x128xf32>
    %c1_58 = arith.constant 1 : index
    %210 = arith.index_cast %179 : i32 to index
    %c0_59 = arith.constant 0 : index
    %211 = vector.load %arg3[%c1_58, %210, %c0_59] : memref<6x16x128xf32, #tpu.memory_space<vmem>>, vector<1x8x128xf32>
    %212 = vector.shape_cast %211 : vector<1x8x128xf32> to vector<8x128xf32>
    %c1_60 = arith.constant 1 : index
    %213 = arith.index_cast %179 : i32 to index
    %c0_61 = arith.constant 0 : index
    %214 = vector.load %arg4[%c1_60, %213, %c0_61] : memref<6x16x128xf32, #tpu.memory_space<vmem>>, vector<1x8x128xf32>
    %215 = vector.shape_cast %214 : vector<1x8x128xf32> to vector<8x128xf32>
    %216 = arith.mulf %212, %215 : vector<8x128xf32>
    %217 = arith.addf %196, %216 : vector<8x128xf32>
    %218 = arith.mulf %212, %209 : vector<8x128xf32>
    %219 = arith.addf %198, %218 : vector<8x128xf32>
    %220 = arith.mulf %215, %209 : vector<8x128xf32>
    %221 = arith.addf %200, %220 : vector<8x128xf32>
    %222 = arith.mulf %212, %212 : vector<8x128xf32>
    %223 = arith.addf %202, %222 : vector<8x128xf32>
    %224 = arith.mulf %215, %215 : vector<8x128xf32>
    %225 = arith.addf %204, %224 : vector<8x128xf32>
    %226 = arith.mulf %209, %209 : vector<8x128xf32>
    %227 = arith.addf %206, %226 : vector<8x128xf32>
    %c2_62 = arith.constant 2 : index
    %228 = arith.index_cast %179 : i32 to index
    %c0_63 = arith.constant 0 : index
    %229 = vector.load %arg2[%c2_62, %228, %c0_63] : memref<6x16x128xf32, #tpu.memory_space<vmem>>, vector<1x8x128xf32>
    %230 = vector.shape_cast %229 : vector<1x8x128xf32> to vector<8x128xf32>
    %c2_64 = arith.constant 2 : index
    %231 = arith.index_cast %179 : i32 to index
    %c0_65 = arith.constant 0 : index
    %232 = vector.load %arg3[%c2_64, %231, %c0_65] : memref<6x16x128xf32, #tpu.memory_space<vmem>>, vector<1x8x128xf32>
    %233 = vector.shape_cast %232 : vector<1x8x128xf32> to vector<8x128xf32>
    %c2_66 = arith.constant 2 : index
    %234 = arith.index_cast %179 : i32 to index
    %c0_67 = arith.constant 0 : index
    %235 = vector.load %arg4[%c2_66, %234, %c0_67] : memref<6x16x128xf32, #tpu.memory_space<vmem>>, vector<1x8x128xf32>
    %236 = vector.shape_cast %235 : vector<1x8x128xf32> to vector<8x128xf32>
    %237 = arith.mulf %233, %236 : vector<8x128xf32>
    %238 = arith.addf %217, %237 : vector<8x128xf32>
    %239 = arith.mulf %233, %230 : vector<8x128xf32>
    %240 = arith.addf %219, %239 : vector<8x128xf32>
    %241 = arith.mulf %236, %230 : vector<8x128xf32>
    %242 = arith.addf %221, %241 : vector<8x128xf32>
    %243 = arith.mulf %233, %233 : vector<8x128xf32>
    %244 = arith.addf %223, %243 : vector<8x128xf32>
    %245 = arith.mulf %236, %236 : vector<8x128xf32>
    %246 = arith.addf %225, %245 : vector<8x128xf32>
    %247 = arith.mulf %230, %230 : vector<8x128xf32>
    %248 = arith.addf %227, %247 : vector<8x128xf32>
    %249 = math.rsqrt %244 : vector<8x128xf32>
    %250 = math.rsqrt %246 : vector<8x128xf32>
    %251 = math.rsqrt %248 : vector<8x128xf32>
    %252 = arith.mulf %249, %250 : vector<8x128xf32>
    %253 = arith.mulf %238, %252 : vector<8x128xf32>
    %254 = math.absf %253 : vector<8x128xf32>
    %255 = arith.mulf %249, %251 : vector<8x128xf32>
    %256 = arith.mulf %240, %255 : vector<8x128xf32>
    %257 = math.absf %256 : vector<8x128xf32>
    %258 = arith.mulf %250, %251 : vector<8x128xf32>
    %259 = arith.mulf %242, %258 : vector<8x128xf32>
    %260 = math.absf %259 : vector<8x128xf32>
    %261 = arith.subf %254, %257 : vector<8x128xf32>
    %262 = arith.subf %254, %260 : vector<8x128xf32>
    %263 = arith.mulf %261, %261 : vector<8x128xf32>
    %264 = arith.addf %175, %263 : vector<8x128xf32>
    %265 = arith.mulf %262, %262 : vector<8x128xf32>
    %266 = arith.addf %177, %265 : vector<8x128xf32>
    %cst_68 = arith.constant 0.000000e+00 : f32
    %267 = vector.broadcast %cst_68 : f32 to vector<8x128xf32>
    %cst_69 = arith.constant 0.000000e+00 : f32
    %268 = vector.broadcast %cst_69 : f32 to vector<8x128xf32>
    %cst_70 = arith.constant 0.000000e+00 : f32
    %269 = vector.broadcast %cst_70 : f32 to vector<8x128xf32>
    %cst_71 = arith.constant 0.000000e+00 : f32
    %270 = vector.broadcast %cst_71 : f32 to vector<8x128xf32>
    %cst_72 = arith.constant 0.000000e+00 : f32
    %271 = vector.broadcast %cst_72 : f32 to vector<8x128xf32>
    %cst_73 = arith.constant 0.000000e+00 : f32
    %272 = vector.broadcast %cst_73 : f32 to vector<8x128xf32>
    %c3_74 = arith.constant 3 : index
    %273 = arith.index_cast %179 : i32 to index
    %c0_75 = arith.constant 0 : index
    %274 = vector.load %arg2[%c3_74, %273, %c0_75] : memref<6x16x128xf32, #tpu.memory_space<vmem>>, vector<1x8x128xf32>
    %275 = vector.shape_cast %274 : vector<1x8x128xf32> to vector<8x128xf32>
    %c3_76 = arith.constant 3 : index
    %276 = arith.index_cast %179 : i32 to index
    %c0_77 = arith.constant 0 : index
    %277 = vector.load %arg3[%c3_76, %276, %c0_77] : memref<6x16x128xf32, #tpu.memory_space<vmem>>, vector<1x8x128xf32>
    %278 = vector.shape_cast %277 : vector<1x8x128xf32> to vector<8x128xf32>
    %c3_78 = arith.constant 3 : index
    %279 = arith.index_cast %179 : i32 to index
    %c0_79 = arith.constant 0 : index
    %280 = vector.load %arg4[%c3_78, %279, %c0_79] : memref<6x16x128xf32, #tpu.memory_space<vmem>>, vector<1x8x128xf32>
    %281 = vector.shape_cast %280 : vector<1x8x128xf32> to vector<8x128xf32>
    %282 = arith.mulf %278, %281 : vector<8x128xf32>
    %283 = arith.addf %267, %282 : vector<8x128xf32>
    %284 = arith.mulf %278, %275 : vector<8x128xf32>
    %285 = arith.addf %268, %284 : vector<8x128xf32>
    %286 = arith.mulf %281, %275 : vector<8x128xf32>
    %287 = arith.addf %269, %286 : vector<8x128xf32>
    %288 = arith.mulf %278, %278 : vector<8x128xf32>
    %289 = arith.addf %270, %288 : vector<8x128xf32>
    %290 = arith.mulf %281, %281 : vector<8x128xf32>
    %291 = arith.addf %271, %290 : vector<8x128xf32>
    %292 = arith.mulf %275, %275 : vector<8x128xf32>
    %293 = arith.addf %272, %292 : vector<8x128xf32>
    %c4_80 = arith.constant 4 : index
    %294 = arith.index_cast %179 : i32 to index
    %c0_81 = arith.constant 0 : index
    %295 = vector.load %arg2[%c4_80, %294, %c0_81] : memref<6x16x128xf32, #tpu.memory_space<vmem>>, vector<1x8x128xf32>
    %296 = vector.shape_cast %295 : vector<1x8x128xf32> to vector<8x128xf32>
    %c4_82 = arith.constant 4 : index
    %297 = arith.index_cast %179 : i32 to index
    %c0_83 = arith.constant 0 : index
    %298 = vector.load %arg3[%c4_82, %297, %c0_83] : memref<6x16x128xf32, #tpu.memory_space<vmem>>, vector<1x8x128xf32>
    %299 = vector.shape_cast %298 : vector<1x8x128xf32> to vector<8x128xf32>
    %c4_84 = arith.constant 4 : index
    %300 = arith.index_cast %179 : i32 to index
    %c0_85 = arith.constant 0 : index
    %301 = vector.load %arg4[%c4_84, %300, %c0_85] : memref<6x16x128xf32, #tpu.memory_space<vmem>>, vector<1x8x128xf32>
    %302 = vector.shape_cast %301 : vector<1x8x128xf32> to vector<8x128xf32>
    %303 = arith.mulf %299, %302 : vector<8x128xf32>
    %304 = arith.addf %283, %303 : vector<8x128xf32>
    %305 = arith.mulf %299, %296 : vector<8x128xf32>
    %306 = arith.addf %285, %305 : vector<8x128xf32>
    %307 = arith.mulf %302, %296 : vector<8x128xf32>
    %308 = arith.addf %287, %307 : vector<8x128xf32>
    %309 = arith.mulf %299, %299 : vector<8x128xf32>
    %310 = arith.addf %289, %309 : vector<8x128xf32>
    %311 = arith.mulf %302, %302 : vector<8x128xf32>
    %312 = arith.addf %291, %311 : vector<8x128xf32>
    %313 = arith.mulf %296, %296 : vector<8x128xf32>
    %314 = arith.addf %293, %313 : vector<8x128xf32>
    %c5_86 = arith.constant 5 : index
    %315 = arith.index_cast %179 : i32 to index
    %c0_87 = arith.constant 0 : index
    %316 = vector.load %arg2[%c5_86, %315, %c0_87] : memref<6x16x128xf32, #tpu.memory_space<vmem>>, vector<1x8x128xf32>
    %317 = vector.shape_cast %316 : vector<1x8x128xf32> to vector<8x128xf32>
    %c5_88 = arith.constant 5 : index
    %318 = arith.index_cast %179 : i32 to index
    %c0_89 = arith.constant 0 : index
    %319 = vector.load %arg3[%c5_88, %318, %c0_89] : memref<6x16x128xf32, #tpu.memory_space<vmem>>, vector<1x8x128xf32>
    %320 = vector.shape_cast %319 : vector<1x8x128xf32> to vector<8x128xf32>
    %c5_90 = arith.constant 5 : index
    %321 = arith.index_cast %179 : i32 to index
    %c0_91 = arith.constant 0 : index
    %322 = vector.load %arg4[%c5_90, %321, %c0_91] : memref<6x16x128xf32, #tpu.memory_space<vmem>>, vector<1x8x128xf32>
    %323 = vector.shape_cast %322 : vector<1x8x128xf32> to vector<8x128xf32>
    %324 = arith.mulf %320, %323 : vector<8x128xf32>
    %325 = arith.addf %304, %324 : vector<8x128xf32>
    %326 = arith.mulf %320, %317 : vector<8x128xf32>
    %327 = arith.addf %306, %326 : vector<8x128xf32>
    %328 = arith.mulf %323, %317 : vector<8x128xf32>
    %329 = arith.addf %308, %328 : vector<8x128xf32>
    %330 = arith.mulf %320, %320 : vector<8x128xf32>
    %331 = arith.addf %310, %330 : vector<8x128xf32>
    %332 = arith.mulf %323, %323 : vector<8x128xf32>
    %333 = arith.addf %312, %332 : vector<8x128xf32>
    %334 = arith.mulf %317, %317 : vector<8x128xf32>
    %335 = arith.addf %314, %334 : vector<8x128xf32>
    %336 = math.rsqrt %331 : vector<8x128xf32>
    %337 = math.rsqrt %333 : vector<8x128xf32>
    %338 = math.rsqrt %335 : vector<8x128xf32>
    %339 = arith.mulf %336, %337 : vector<8x128xf32>
    %340 = arith.mulf %325, %339 : vector<8x128xf32>
    %341 = math.absf %340 : vector<8x128xf32>
    %342 = arith.mulf %336, %338 : vector<8x128xf32>
    %343 = arith.mulf %327, %342 : vector<8x128xf32>
    %344 = math.absf %343 : vector<8x128xf32>
    %345 = arith.mulf %337, %338 : vector<8x128xf32>
    %346 = arith.mulf %329, %345 : vector<8x128xf32>
    %347 = math.absf %346 : vector<8x128xf32>
    %348 = arith.subf %341, %344 : vector<8x128xf32>
    %349 = arith.subf %341, %347 : vector<8x128xf32>
    %350 = arith.mulf %348, %348 : vector<8x128xf32>
    %351 = arith.addf %264, %350 : vector<8x128xf32>
    %352 = arith.mulf %349, %349 : vector<8x128xf32>
    %353 = arith.addf %266, %352 : vector<8x128xf32>
    %c2_i32 = arith.constant 2 : i32
    %c0_92 = arith.constant 0 : index
    %c0_93 = arith.constant 0 : index
    %c0_94 = arith.constant 0 : index
    %c0_95 = arith.constant 0 : index
    %c0_96 = arith.constant 0 : index
    %354 = vector.load %arg5[%c0_92, %c0_93, %c0_94, %c0_95, %c0_96] : memref<1x1x2x8x128xf32, #tpu.memory_space<vmem>>, vector<1x1x1x8x128xf32>
    %355 = vector.shape_cast %354 : vector<1x1x1x8x128xf32> to vector<8x128xf32>
    %356 = vector.shape_cast %351 : vector<8x128xf32> to vector<1x1x1x8x128xf32>
    tpu.vector_store %arg5[%c0_92, %c0_93, %c0_94, %c0_95, %c0_96], %356 {strides = array<i32>} : memref<1x1x2x8x128xf32, #tpu.memory_space<vmem>>, vector<1x1x1x8x128xf32>,
    %c0_97 = arith.constant 0 : index
    %c0_98 = arith.constant 0 : index
    %c1_99 = arith.constant 1 : index
    %c0_100 = arith.constant 0 : index
    %c0_101 = arith.constant 0 : index
    %357 = vector.load %arg5[%c0_97, %c0_98, %c1_99, %c0_100, %c0_101] : memref<1x1x2x8x128xf32, #tpu.memory_space<vmem>>, vector<1x1x1x8x128xf32>
    %358 = vector.shape_cast %357 : vector<1x1x1x8x128xf32> to vector<8x128xf32>
    %359 = vector.shape_cast %353 : vector<8x128xf32> to vector<1x1x1x8x128xf32>
    tpu.vector_store %arg5[%c0_97, %c0_98, %c1_99, %c0_100, %c0_101], %359 {strides = array<i32>} : memref<1x1x2x8x128xf32, #tpu.memory_space<vmem>>, vector<1x1x1x8x128xf32>,
    return
  }
  func.func @transform_0(%arg0: i32, %arg1: i32) -> (i32, i32, i32) {
    %c0_i32 = arith.constant 0 : i32
    %c0_i32_0 = arith.constant 0 : i32
    return %arg0, %arg1, %c0_i32 : i32, i32, i32
  }
  func.func @transform_1(%arg0: i32, %arg1: i32) -> (i32, i32, i32) {
    %c0_i32 = arith.constant 0 : i32
    %c0_i32_0 = arith.constant 0 : i32
    return %arg0, %arg1, %c0_i32 : i32, i32, i32
  }
  func.func @transform_2(%arg0: i32, %arg1: i32) -> (i32, i32, i32) {
    %c0_i32 = arith.constant 0 : i32
    %c0_i32_0 = arith.constant 0 : i32
    return %arg0, %arg1, %c0_i32 : i32, i32, i32
  }
  func.func @transform_3(%arg0: i32, %arg1: i32) -> (i32, i32, i32, i32, i32) {
    %c0_i32 = arith.constant 0 : i32
    %c0_i32_0 = arith.constant 0 : i32
    %c0_i32_1 = arith.constant 0 : i32
    %c0_i32_2 = arith.constant 0 : i32
    return %arg0, %arg1, %c0_i32, %c0_i32_0, %c0_i32_1 : i32, i32, i32, i32, i32
  }
}

</mosaic_0001>

<bundles_post_ra>
// kernel: tpu_custom_call.1
= control target key start
LH: loop header
LB: loop body
LE: loop exit
PB: predicated region body
PF: predicated region fallthrough
CT: control target
= control target key end

     0   :  { %s1576_s0 = inlined_call_operand.hbm [shape: f32[6,32,128], index: 0, kind: input, shape index: {}]   ;;  %s1577_s1 = inlined_call_operand.hbm [shape: f32[6,32,128], index: 1, kind: input, shape index: {}]   ;;  %s1578_s2 = inlined_call_operand.hbm [shape: f32[6,32,128], index: 2, kind: input, shape index: {}]   ;;  %s1579_s3 = inlined_call_operand.hbm [shape: f32[1,2,2,8,128], index: 3, kind: output, shape index: {}]  }
   0x1   :  { %1580 = sst [smem:[#allocation21_spill]] %s1576_s0 }
   0x2   :  { %8 = vsyncpa [#allocation3], 0 }
   0x3   :  { %10 = vsyncpa [#allocation3 + $0x1], 0 }
   0x4   :  { %11 = vsyncpa [#allocation6], 0 }
   0x5   :  { %13 = vsyncpa [#allocation6 + $0x1], 0 }
   0x6   :  { %14 = vsyncpa [#allocation4], 0 }
   0x7   :  { %16 = vsyncpa [#allocation4 + $0x1], 0  ;;  %s1174_s12 = smov 0   ;;  %s1176_s13 = smov 0  }
   0x8   :  { %s1178_s14 = smov 0   ;;  %s1180_s15 = smov 0  }
   0x9   :  { %s1182_s16 = smov 0   ;;  %s1184_s17 = smov 0  }
   0xa LB: > { %s1205_s18 = sadd.s32 4294967295, %s1131_s17   ;;  %s857_s19 = sadd.s32 4294967294, %s1131_s17   ;;  %s1131_s17 = sphi %s1184_s17, %s22_s17   ;;  %s1127_s16 = sphi %s1182_s16, %s1590_s16   ;;  %s1123_s15 = sphi %s1180_s15, %s1589_s15   ;;  %s1119_s14 = sphi %s1178_s14, %s1588_s14   ;;  %s1115_s13 = sphi %s1176_s13, %s1587_s13   ;;  %s1111_s12 = sphi %s1174_s12, %s1586_s12  }
   0xb   : > { %s31_s20 = sadd.s32 1, %s1127_s16  ;;  %s43_s21 = sadd.s32 1, %s1119_s14 }
   0xc   : > { %p32_p0 = scmp.ge.s32.totalorder %s31_s20, 2  ;;  %p50_p1 = scmp.ne.s32.totalorder %s1119_s14, %s1115_s13 }
   0xd   : > { %p51_p2 = scmp.eq.s32.totalorder %s1131_s17, 0  ;;  %p56_p3 = scmp.ne.s32.totalorder %s1115_s13, %s1111_s12 }
   0xe   : > { %s1592_s20 = smov (%p32_p0, %s31_s20), 0  ;;  %p57_p5 = scmp.eq.s32.totalorder %s1205_s18, 0 }
   0xf   : > { %p1217_p4 = por %p51_p2, %p50_p1  ;;  %s39_s23 = ssub.s32 %s1127_s16, %s1592_s20 }
  0x10   : > { %p138_p6 = scmp.eq.s32.totalorder %s1205_s18, 1  ;;  %p41_p7 = scmp.eq.s32.totalorder %s39_s23, 0 }
  0x11   : > { %p1225_p8 = por %p57_p5, %p56_p3  ;;  %p144_p10 = scmp.eq.s32.totalorder %s857_s19, 1 }
  0x12   : > { %p1229_p9 = por %p138_p6, %p50_p1  ;;  %p859_p12 = scmp.ge.s32.totalorder %s1131_s17, 2 }
  0x13   : > { %s1234_s26 = scalar_select %p41_p7, %s1119_s14, %s43_s21  }
  0x14   : > { %p1236_p11 = por %p144_p10, %p56_p3  ;;  %160 = sbr.rel (%p859_p12) target bundleno = 63 (0x3f), region = 16 }
  0x19   : > { %s164_s28 = sand.u32 1, %s1119_s14   ;;  %s1247_s30 = sshll.u32 %s1127_s16, 8 }
  0x1a   : > { %s1244_s29 = smul.u32 96, %s164_s28  ;;  %s1133_s4 = smov 512  }
  0x1b   : > { %922 = sst [smem:[#allocation10]] (%p1217_p4), %s1133_s4  ;;  %s1134_s19 = smov 256  }
  0x1c   : > { %s921_s5 = scalar_select %p1217_p4, [#allocation0], [#allocation15] }
  0x1d   : > { %s1585_s0 = sld [smem:[#allocation21_spill]]  ;;  %s168_s10 = scalar_lea.vmem [#allocation2], %s1244_s29 }
  0x1e   : > { %s182_s9 = sld [smem:[%s921_s5]]   ;;  %s190_s11 = sshll.u32 %s168_s10, 4  ;;  %s191_s11 = int_to_ptr.vmem [resolvable:$true] %s190_s11 }
  0x1f   : > { %923 = sst [smem:[#allocation10 + $0x1]] (%p1217_p4), %s1134_s19  ;;  %s1135_s21 = smov 2  }
  0x20   : > { %924 = sst [smem:[#allocation10 + $0x2]] (%p1217_p4), %s1135_s21  ;;  %s1136_s23 = smov 128  }
  0x21   : > { %925 = sst [smem:[#allocation10 + $0x3]] (%p1217_p4), %s1136_s23  ;;  %s1137_s4 = smov 8  }
  0x22   : > { %926 = sst [smem:[#allocation10 + $0x4]] (%p1217_p4), %s1136_s23  ;;  %s165_s7 = scalar_lea.sflag [#allocation3], %s164_s28 }
  0x23   : > { %s177_s8 = scalar_lea.hbm %s1585_s0, %s1247_s30  ;;  %927 = sst [smem:[#allocation10 + $0x5]] (%p1217_p4), %s1137_s4 }
  0x24   : > { %s862_s6 = sshll.u32 %s182_s9, 26  ;;  %s1138_s0 = smov 131072  }
  0x25   : > { %s863_s5 = sadd.s32 134217728, %s862_s6 }
  0x26   : > { %928 = dma.general (%p1217_p4), %s177_s8, 1536, %s191_s11, %s165_s7, %s1138_s0, [#allocation10], %s863_s5, 0  }
  0x27   : > { %s213_s10 = sand.u32 1, %s1131_s17   ;;  %s226_s23 = scalar_lea.hbm %s1577_s1, %s1247_s30 }
  0x28   : > { %s929_s9 = scalar_select %p1217_p4, [#allocation0], [#allocation16] }
  0x29   : > { %s217_s28 = scalar_lea.vmem [#allocation5], %s1244_s29  ;;  %s1139_s8 = smov 512  }
  0x2a   : > { %s239_s4 = sshll.u32 %s217_s28, 4  ;;  %s231_s0 = sld [smem:[%s929_s9]]   ;;  %s240_s4 = int_to_ptr.vmem [resolvable:$true] %s239_s4 }
  0x2b   : > { %930 = sst [smem:[#allocation12]] (%p1217_p4), %s1139_s8  ;;  %s1140_s11 = smov 256  }
  0x2c   : > { %931 = sst [smem:[#allocation12 + $0x1]] (%p1217_p4), %s1140_s11  ;;  %s1141_s6 = smov 2  }
  0x2d   : > { %932 = sst [smem:[#allocation12 + $0x2]] (%p1217_p4), %s1141_s6  ;;  %s1142_s5 = smov 128  }
  0x2e   : > { %933 = sst [smem:[#allocation12 + $0x3]] (%p1217_p4), %s1142_s5  ;;  %s1143_s19 = smov 8  }
  0x2f   : > { %934 = sst [smem:[#allocation12 + $0x4]] (%p1217_p4), %s1142_s5  ;;  %s214_s9 = scalar_lea.sflag [#allocation6], %s213_s10 }
  0x30   : > { %s866_s7 = sshll.u32 %s231_s0, 26  ;;  %935 = sst [smem:[#allocation12 + $0x5]] (%p1217_p4), %s1143_s19 }
  0x31   : > { %s867_s21 = sadd.s32 134217728, %s866_s7  ;;  %s1144_s28 = smov 131072  }
  0x32   : > { %936 = dma.general (%p1217_p4), %s226_s23, 1536, %s240_s4, %s214_s9, %s1144_s28, [#allocation12], %s867_s21, 0  }
  0x33   : > { %s275_s0 = scalar_lea.hbm %s1578_s2, %s1247_s30  ;;  %s266_s5 = scalar_lea.vmem [#allocation7], %s1244_s29 }
  0x34   : > { %s937_s6 = scalar_select %p1217_p4, [#allocation0], [#allocation17] }
  0x35   : > { %s288_s10 = sshll.u32 %s266_s5, 4  ;;  %s1145_s23 = smov 512   ;;  %s289_s10 = int_to_ptr.vmem [resolvable:$true] %s288_s10 }
  0x36   : > { %s280_s7 = sld [smem:[%s937_s6]]   ;;  %s1146_s4 = smov 256  }
  0x37   : > { %938 = sst [smem:[#allocation14]] (%p1217_p4), %s1145_s23  ;;  %s1147_s19 = smov 2  }
  0x38   : > { %939 = sst [smem:[#allocation14 + $0x1]] (%p1217_p4), %s1146_s4  ;;  %s1148_s21 = smov 128  }
  0x39   : > { %940 = sst [smem:[#allocation14 + $0x2]] (%p1217_p4), %s1147_s19  ;;  %s1149_s29 = smov 8  }
  0x3a   : > { %941 = sst [smem:[#allocation14 + $0x3]] (%p1217_p4), %s1148_s21  ;;  %s1150_s8 = smov 131072  }
  0x3b   : > { %942 = sst [smem:[#allocation14 + $0x4]] (%p1217_p4), %s1148_s21 }
  0x3c   : > { %s870_s30 = sshll.u32 %s280_s7, 26  ;;  %943 = sst [smem:[#allocation14 + $0x5]] (%p1217_p4), %s1149_s29 }
  0x3d   : > { %s871_s28 = sadd.s32 134217728, %s870_s30 }
  0x3e   : > { %944 = dma.general (%p1217_p4), %s275_s0, 1536, %s289_s10, %s214_s9, %s1150_s8, [#allocation14], %s871_s28, 0  }
  0x3f PF: > { %p872_p13 = scmp.ge.s32.totalorder %s1131_s17, 1  ;;  %p309_p0 = scmp.lt.s32.totalorder %s1131_s17, 3 }
  0x41   : > { %p310_p1 = pnand %p872_p13, %p309_p0 }
  0x42   : > { %s1316_s11 = sand.u32 (!%p310_p1), 1, %s1115_s13  }
  0x43   : > { %313 = sbr.rel (%p310_p1) target bundleno = 148 (0x94), region = 32  ;;  %s316_s5 = scalar_lea.sflag (!%p310_p1), [#allocation3], %s1316_s11 }
  0x44   : > { %s920_s6 = smul.u32 (!%p310_p1), 96, %s1316_s11 }
  0x46   : > { %s1320_s7 = scalar_lea.vmem (!%p310_p1), [#allocation2], %s920_s6 }
  0x48   : > { %1098 = dma.done.wait (%p1225_p8), %s316_s5, 1536  }
  0x49   : > { %1100 = vsyncadd (%p1225_p8), %s316_s5, 4294965760  ;;  %s324_s22 = sand.u32 1, %s1205_s18   ;;  %s1327_s0 = scalar_lea.vmem [#allocation5], %s920_s6 }
  0x4a   : > { %s325_s9 = scalar_lea.sflag [#allocation6], %s324_s22 }
  0x4b   : > { %1102 = dma.done.wait (%p1225_p8), %s325_s9, 3072  }
  0x4c   : > { %1104 = vsyncadd (%p1225_p8), %s325_s9, 4294964224  ;;  %v1334_v0 = vld [vmem:[%s1320_s7] sm:$0xff]  ;;  %s1337_s10 = scalar_lea.vmem [#allocation7], %s920_s6  ;;  %v1345_v5 = vld [vmem:[%s1320_s7 + $0x10] sm:$0xff]  ;;  %s873_s18 = sshll.u32 %s1316_s11, 4 }
  0x4d   : > { %v377_v1 = vld [vmem:[%s1327_s0] sm:$0xff]  ;;  %v875_v6 = vld [vmem:[%s1327_s0 + $0x10] sm:$0xff]  ;;  %v389_v8 = vmul.f32 %v1334_v0, %v1334_v0  ;;  %v408_v14 = vmul.f32 %v1345_v5, %v1345_v5  ;;  %v890_v51 = vld [vmem:[%s1327_s0 + $0x8] sm:$0xff]  ;;  %s369_s24 = scalar_lea.vmem [#allocation8], %s873_s18  ;;  %s916_s4 = sshll.u32 %s1123_s15, 8 }
  0x4e   : > { %v1340_v2 = vld [vmem:[%s1337_s10] sm:$0xff]  ;;  %v385_v3 = vmul.f32 %v377_v1, %v377_v1  ;;  %v1349_v7 = vld [vmem:[%s1337_s10 + $0x10] sm:$0xff]  ;;  %v404_v9 = vmul.f32 %v875_v6, %v875_v6  ;;  %v381_v25 = vmul.f32 %v377_v1, %v1334_v0  ;;  %v400_v30 = vmul.f32 %v875_v6, %v1345_v5  ;;  %v1407_v52 = vld [vmem:[%s1337_s10 + $0x8] sm:$0xff]  ;;  %s690_s23 = sshll.u32 %s369_s24, 4  ;;  %s1528_s30 = scalar_lea.hbm %s1579_s3, %s916_s4  ;;  %s1523_s23 = int_to_ptr.vmem [resolvable:$true] %s690_s23 }
  0x4f   : > { %v387_v4 = vmul.f32 %v1340_v2, %v1340_v2  ;;  %v1354_v10 = vld [vmem:[%s1320_s7 + $0x20] sm:$0xff]  ;;  %v406_v13 = vmul.f32 %v1349_v7, %v1349_v7  ;;  %v881_v17 = vld [vmem:[%s1327_s0 + $0x30] sm:$0xff]  ;;  %v409_v19 = vadd.f32 %v408_v14, %v389_v8  ;;  %v379_v24 = vmul.f32 %v1340_v2, %v377_v1  ;;  %v1413_v57 = vld [vmem:[%s1320_s7 + $0x8] sm:$0xff]  ;;  %s675_s29 = scalar_lea.sflag [#allocation4], %s1316_s11  ;;  %s1047_s28 = scalar_lea.vmem %s1523_s23, 256 }
  0x50   : > { %v878_v11 = vld [vmem:[%s1327_s0 + $0x20] sm:$0xff]  ;;  %v405_v15 = vadd.f32 %v404_v9, %v385_v3  ;;  %v427_v21 = vmul.f32 %v1354_v10, %v1354_v10  ;;  %v1370_v22 = vld [vmem:[%s1320_s7 + $0x30] sm:$0xff]  ;;  %v398_v26 = vmul.f32 %v1349_v7, %v875_v6  ;;  %v460_v33 = vmul.f32 %v881_v17, %v881_v17  ;;  %v1420_v62 = vld [vmem:[%s1320_s7 + $0x18] sm:$0xff]  ;;  %p1048_p2 = scmp.ne.s32.totalorder %s1523_s23, %s1047_s28  ;;  %s1151_s15 = smov [#allocation8]  }
  0x51   : > { %v1358_v12 = vld [vmem:[%s1337_s10 + $0x20] sm:$0xff]  ;;  %v423_v16 = vmul.f32 %v878_v11, %v878_v11  ;;  %v407_v18 = vadd.f32 %v406_v13, %v387_v4  ;;  %v1373_v23 = vld [vmem:[%s1337_s10 + $0x30] sm:$0xff]  ;;  %v464_v37 = vmul.f32 %v1370_v22, %v1370_v22  ;;  %v419_v44 = vmul.f32 %v878_v11, %v1354_v10  ;;  %v893_v63 = vld [vmem:[%s1327_s0 + $0x18] sm:$0xff]  ;;  %s1051_s8 = sshll.u32 %s1151_s15, 4  ;;  %s1052_s8 = int_to_ptr.vmem [resolvable:$false] %s1051_s8 }
  0x52   : > { %v425_v20 = vmul.f32 %v1358_v12, %v1358_v12  ;;  %v884_v28 = vld [vmem:[%s1327_s0 + $0x40] sm:$0xff]  ;;  %v428_v32 = vadd.f32 %v427_v21, %v409_v19  ;;  %v454_v35 = vmul.f32 %v1373_v23, %v881_v17  ;;  %v462_v36 = vmul.f32 %v1373_v23, %v1373_v23  ;;  %v887_v41 = vld [vmem:[%s1327_s0 + $0x50] sm:$0xff]  ;;  %v1424_v1 = vld [vmem:[%s1337_s10 + $0x18] sm:$0xff]  ;;  %p1049_p3 = pnand %p1048_p2, %p1229_p9  ;;  %s1053_s6 = scalar_lea.vmem %s1052_s8, 512 }
  0x53   : > { %v424_v27 = vadd.f32 %v423_v16, %v405_v15  ;;  %v1380_v29 = vld [vmem:[%s1337_s10 + $0x40] sm:$0xff]  ;;  %v479_v39 = vmul.f32 %v884_v28, %v884_v28  ;;  %v1396_v42 = vld [vmem:[%s1337_s10 + $0x50] sm:$0xff]  ;;  %v417_v43 = vmul.f32 %v1358_v12, %v878_v11  ;;  %v399_v47 = vadd.f32 %v398_v26, %v379_v24  ;;  %v1438_v19 = vld [vmem:[%s1337_s10 + $0x28] sm:$0xff]  ;;  %p1054_p5 = scmp.lt.s32.totalorder %s1523_s23, %s1052_s8  ;;  %p1055_p6 = scmp.lt.s32.totalorder %s1053_s6, %s1047_s28 }
  0x54   : > { %v426_v31 = vadd.f32 %v425_v20, %v407_v18  ;;  %v1384_v34 = vld [vmem:[%s1320_s7 + $0x40] sm:$0xff]  ;;  %v473_v38 = vmul.f32 %v1380_v29, %v884_v28  ;;  %v481_v40 = vmul.f32 %v1380_v29, %v1380_v29  ;;  %v1403_v46 = vld [vmem:[%s1320_s7 + $0x50] sm:$0xff]  ;;  %v401_v48 = vadd.f32 %v400_v30, %v381_v25  ;;  %v896_v18 = vld [vmem:[%s1327_s0 + $0x28] sm:$0xff]  ;;  %p1050_p4 = pneg %p1049_p3 }
  0x55   : > { %1023 = vrsqrt.f32 %v424_v27  ;;  %v483_v45 = vmul.f32 %v1384_v34, %v1384_v34  ;;  %v480_v49 = vadd.f32 %v479_v39, %v460_v33  ;;  %v456_v53 = vmul.f32 %v881_v17, %v1370_v22  ;;  %v1443_v25 = vld [vmem:[%s1320_s7 + $0x28] sm:$0xff]  ;;  %v899_v30 = vld [vmem:[%s1327_s0 + $0x38] sm:$0xff]  ;;  %p1056_p7 = por %p1055_p6, %p1054_p5 }
  0x56   : > { %1025 = vrsqrt.f32 %v426_v31  ;;  %v482_v50 = vadd.f32 %v481_v40, %v462_v36  ;;  %v498_v55 = vmul.f32 %v887_v41, %v887_v41  ;;  %v500_v56 = vmul.f32 %v1396_v42, %v1396_v42  ;;  %v1447_v31 = vld [vmem:[%s1337_s10 + $0x38] sm:$0xff] }
  0x57   : > { %1027 = vrsqrt.f32 %v428_v32  ;;  %v484_v54 = vadd.f32 %v483_v45, %v464_v37  ;;  %v474_v58 = vadd.f32 %v473_v38, %v454_v35  ;;  %v475_v59 = vmul.f32 %v884_v28, %v1384_v34  ;;  %v1458_v45 = vld [vmem:[%s1337_s10 + $0x48] sm:$0xff]  ;;  %p1057_p8 = pnand %p1056_p7, %p1050_p4 }
  0x58   : > { %v492_v60 = vmul.f32 %v1396_v42, %v887_v41  ;;  %v502_v61 = vmul.f32 %v1403_v46, %v1403_v46  ;;  %v499_v3 = vadd.f32 %v498_v55, %v480_v49  ;;  %v501_v4 = vadd.f32 %v500_v56, %v482_v50 }
  0x59   : > { %v534_v6 = vmul.f32 %v890_v51, %v890_v51  ;;  %v536_v8 = vmul.f32 %v1407_v52, %v1407_v52  ;;  %v528_v11 = vmul.f32 %v1407_v52, %v890_v51  ;;  %v538_v13 = vmul.f32 %v1413_v57, %v1413_v57 }
  0x5a   : > { %v503_v9 = vadd.f32 %v502_v61, %v484_v54  ;;  %v547_v14 = vmul.f32 %v1424_v1, %v893_v63  ;;  %1029 = vrsqrt.f32 %v499_v3  ;;  %v553_v15 = vmul.f32 %v893_v63, %v893_v63 }
  0x5b   : > { %v555_v16 = vmul.f32 %v1424_v1, %v1424_v1  ;;  %v557_v17 = vmul.f32 %v1420_v62, %v1420_v62  ;;  %v418_v20 = vadd.f32 %v417_v43, %v399_v47  ;;  %1031 = vrsqrt.f32 %v501_v4  ;;  %v902_v43 = vld [vmem:[%s1327_s0 + $0x48] sm:$0xff] }
  0x5c   : > { %v530_v21 = vmul.f32 %v890_v51, %v1413_v57  ;;  %v549_v24 = vmul.f32 %v893_v63, %v1420_v62  ;;  %1033 = vrsqrt.f32 %v503_v9  ;;  %v554_v26 = vadd.f32 %v553_v15, %v534_v6  ;;  %v905_v9 = vld [vmem:[%s1327_s0 + $0x58] sm:$0xff] }
  0x5d   : > { %v556_v27 = vadd.f32 %v555_v16, %v536_v8  ;;  %v558_v28 = vadd.f32 %v557_v17, %v538_v13  ;;  %v420_v32 = vadd.f32 %v419_v44, %v401_v48  ;;  %v476_v33 = vadd.f32 %v475_v59, %v456_v53  ;;  %v1461_v48 = vld [vmem:[%s1320_s7 + $0x38] sm:$0xff] }
  0x5e   : > { %v572_v35 = vmul.f32 %v896_v18, %v896_v18  ;;  %v574_v36 = vmul.f32 %v1438_v19, %v1438_v19  ;;  %v1451_v37 = vadd.f32 %v492_v60, %v474_v58  ;;  %v494_v38 = vmul.f32 %v887_v41, %v1403_v46  ;;  %v1469_v60 = vld [vmem:[%s1320_s7 + $0x48] sm:$0xff]  ;;  %v1477_v8 = vld [vmem:[%s1320_s7 + $0x58] sm:$0xff] }
  0x5f   : > { %v548_v39 = vadd.f32 %v547_v14, %v528_v11  ;;  %v576_v40 = vmul.f32 %v1443_v25, %v1443_v25  ;;  %v609_v50 = vmul.f32 %v899_v30, %v899_v30  ;;  %v611_v51 = vmul.f32 %v1447_v31, %v1447_v31  ;;  %v1481_v11 = vld [vmem:[%s1337_s10 + $0x58] sm:$0xff] }
  0x60   : > { %v573_v49 = vadd.f32 %v572_v35, %v554_v26  ;;  %v575_v44 = vadd.f32 %v574_v36, %v556_v27  ;;  %v550_v41 = vadd.f32 %v549_v24, %v530_v21  ;;  %v566_v54 = vmul.f32 %v1438_v19, %v896_v18 }
  0x61   : > { %v568_v55 = vmul.f32 %v896_v18, %v1443_v25  ;;  %v577_v56 = vadd.f32 %v576_v40, %v558_v28  ;;  %v603_v59 = vmul.f32 %v1447_v31, %v899_v30  ;;  %v628_v61 = vmul.f32 %v902_v43, %v902_v43 }
  0x62   : > { %v1024_v47 = vpop.eup %1023  ;;  %1035 = vrsqrt.f32 %v573_v49  ;;  %v630_v63 = vmul.f32 %v1458_v45, %v1458_v45  ;;  %v613_v4 = vmul.f32 %v1461_v48, %v1461_v48  ;;  %v622_v6 = vmul.f32 %v1458_v45, %v902_v43 }
  0x63   : > { %v1026_v53 = vpop.eup %1025  ;;  %1037 = vrsqrt.f32 %v575_v44  ;;  %v495_v13 = vadd.f32 %v494_v38, %v476_v33  ;;  %v629_v14 = vadd.f32 %v628_v61, %v609_v50  ;;  %v567_v17 = vadd.f32 %v566_v54, %v548_v39 }
  0x64   : > { %v1028_v58 = vpop.eup %1027  ;;  %v432_v3 = vmul.f32 %v1026_v53, %v1024_v47  ;;  %1039 = vrsqrt.f32 %v577_v56  ;;  %v631_v15 = vadd.f32 %v630_v63, %v611_v51  ;;  %v605_v18 = vmul.f32 %v899_v30, %v1461_v48 }
  0x65   : > { %v435_v16 = vmul.f32 %v1028_v58, %v1024_v47  ;;  %v632_v21 = vmul.f32 %v1469_v60, %v1469_v60  ;;  %v569_v24 = vadd.f32 %v568_v55, %v550_v41  ;;  %v647_v26 = vmul.f32 %v905_v9, %v905_v9 }
  0x66   : > { %v649_v27 = vmul.f32 %v1481_v11, %v1481_v11  ;;  %v651_v28 = vmul.f32 %v1477_v8, %v1477_v8  ;;  %v433_v35 = vmul.f32 %v432_v3, %v418_v20  ;;  %v1490_v33 = vadd.f32 %v622_v6, %v603_v59 }
  0x67   : > { %v624_v36 = vmul.f32 %v902_v43, %v1469_v60  ;;  %v633_v38 = vadd.f32 %v632_v21, %v613_v4  ;;  %v1030_v39 = vpop.eup %1029  ;;  %v648_v40 = vadd.f32 %v647_v26, %v629_v14  ;;  %v383_v47 = vmul.f32 %v1340_v2, %v1334_v0 }
  0x68   : > { %v650_v30 = vadd.f32 %v649_v27, %v631_v15  ;;  %v402_v49 = vmul.f32 %v1349_v7, %v1345_v5  ;;  %v1032_v44 = vpop.eup %1031  ;;  %v436_v50 = vmul.f32 %v435_v16, %v420_v32  ;;  %v421_v20 = vmul.f32 %v1358_v12, %v1354_v10 }
  0x69   : > { %v652_v51 = vadd.f32 %v651_v28, %v633_v38  ;;  %v438_v41 = vmul.f32 %v1028_v58, %v1026_v53  ;;  %v1034_v54 = vpop.eup %1033  ;;  %v507_v55 = vmul.f32 %v1032_v44, %v1030_v39  ;;  %1041 = vrsqrt.f32 %v648_v40 }
  0x6a   : > { %v403_v43 = vadd.f32 %v402_v49, %v383_v47  ;;  %v458_v56 = vmul.f32 %v1373_v23, %v1370_v22  ;;  %v434_v59 = vand.u32 2147483647, %v433_v35  ;;  %v510_v61 = vmul.f32 %v1034_v54, %v1030_v39 }
  0x6b   : > { %1043 = vrsqrt.f32 %v650_v30  ;;  %v477_v0 = vmul.f32 %v1380_v29, %v1384_v34  ;;  %v508_v2 = vmul.f32 %v507_v55, %v1451_v37  ;;  %v496_v7 = vmul.f32 %v1396_v42, %v1403_v46 }
  0x6c   : > { %1045 = vrsqrt.f32 %v652_v51  ;;  %v422_v5 = vadd.f32 %v421_v20, %v403_v43  ;;  %v511_v10 = vmul.f32 %v510_v61, %v495_v13  ;;  %v513_v32 = vmul.f32 %v1034_v54, %v1032_v44 }
  0x6d   : > { %v478_v12 = vadd.f32 %v477_v0, %v458_v56  ;;  %v532_v53 = vmul.f32 %v1407_v52, %v1413_v57  ;;  %v437_v22 = vand.u32 2147483647, %v436_v50  ;;  %v551_v58 = vmul.f32 %v1424_v1, %v1420_v62 }
  0x6e   : > { %v439_v23 = vmul.f32 %v438_v41, %v422_v5  ;;  %v570_v29 = vmul.f32 %v1438_v19, %v1443_v25  ;;  %v509_v37 = vand.u32 2147483647, %v508_v2  ;;  %v512_v63 = vand.u32 2147483647, %v511_v10 }
  0x6f   : > { %v1036_v34 = vpop.eup %1035  ;;  %v625_v3 = vadd.f32 %v624_v36, %v605_v18  ;;  %v497_v4 = vadd.f32 %v496_v7, %v478_v12  ;;  %v552_v6 = vadd.f32 %v551_v58, %v532_v53  ;;  %v607_v13 = vmul.f32 %v1447_v31, %v1461_v48 }
  0x70   : > { %v1038_v42 = vpop.eup %1037  ;;  %v440_v46 = vand.u32 2147483647, %v439_v23  ;;  %v626_v52 = vmul.f32 %v1458_v45, %v1469_v60  ;;  %v641_v62 = vmul.f32 %v1481_v11, %v905_v9  ;;  %v643_v1 = vmul.f32 %v905_v9, %v1477_v8 }
  0x71   : > { %v1040_v57 = vpop.eup %1039  ;;  %v581_v14 = vmul.f32 %v1038_v42, %v1036_v34  ;;  %v514_v19 = vmul.f32 %v513_v32, %v497_v4  ;;  %v441_v25 = vsub.f32 %v434_v59, %v437_v22  ;;  %v571_v16 = vadd.f32 %v570_v29, %v552_v6 }
  0x72   : > { %v584_v15 = vmul.f32 %v1040_v57, %v1036_v34  ;;  %v587_v18 = vmul.f32 %v1040_v57, %v1038_v42  ;;  %v516_v21 = vsub.f32 %v509_v37, %v512_v63  ;;  %v442_v27 = vsub.f32 %v434_v59, %v440_v46 }
  0x73   : > { %v582_v26 = vmul.f32 %v581_v14, %v567_v17  ;;  %v515_v28 = vand.u32 2147483647, %v514_v19  ;;  %v627_v48 = vadd.f32 %v626_v52, %v607_v13  ;;  %v645_v45 = vmul.f32 %v1481_v11, %v1477_v8 }
  0x74   : > { %v585_v35 = vmul.f32 %v584_v15, %v569_v24  ;;  %v588_v31 = vmul.f32 %v587_v18, %v571_v16  ;;  %v642_v9 = vadd.f32 %v641_v62, %v1490_v33  ;;  %v443_v30 = vmul.f32 %v441_v25, %v441_v25 }
  0x75   : > { %v583_v60 = vand.u32 2147483647, %v582_v26  ;;  %v517_v36 = vsub.f32 %v509_v37, %v515_v28  ;;  %v518_v47 = vmul.f32 %v516_v21, %v516_v21  ;;  %v445_v49 = vmul.f32 %v442_v27, %v442_v27 }
  0x76   : > { %v586_v38 = vand.u32 2147483647, %v585_v35  ;;  %v589_v39 = vand.u32 2147483647, %v588_v31  ;;  %v1042_v40 = vpop.eup %1041  ;;  %v644_v24 = vadd.f32 %v643_v1, %v625_v3  ;;  %v646_v20 = vadd.f32 %v645_v45, %v627_v48 }
  0x77   : > { %v520_v17 = vmul.f32 %v517_v36, %v517_v36  ;;  %v519_v55 = vadd.f32 %v518_v47, %v443_v30 }
  0x78   : > { %v1044_v44 = vpop.eup %1043  ;;  %v590_v50 = vsub.f32 %v583_v60, %v586_v38  ;;  %v591_v51 = vsub.f32 %v583_v60, %v589_v39 }
  0x79   : > { %v1046_v41 = vpop.eup %1045  ;;  %v656_v54 = vmul.f32 %v1044_v44, %v1042_v40  ;;  %v521_v33 = vadd.f32 %v520_v17, %v445_v49 }
  0x7a   : > { %v659_v8 = vmul.f32 %v1046_v41, %v1042_v40  ;;  %v662_v11 = vmul.f32 %v1046_v41, %v1044_v44  ;;  %v592_v56 = vmul.f32 %v590_v50, %v590_v50  ;;  %v594_v61 = vmul.f32 %v591_v51, %v591_v51 }
  0x7b   : > { %v657_v43 = vmul.f32 %v656_v54, %v642_v9 }
  0x7c   : > { %v660_v59 = vmul.f32 %v659_v8, %v644_v24  ;;  %v663_v0 = vmul.f32 %v662_v11, %v646_v20  ;;  %v593_v10 = vadd.f32 %v592_v56, %v519_v55  ;;  %v595_v32 = vadd.f32 %v594_v61, %v521_v33 }
  0x7d   : > { %v658_v2 = vand.u32 2147483647, %v657_v43 }
  0x7e   : > { %v661_v5 = vand.u32 2147483647, %v660_v59  ;;  %v664_v7 = vand.u32 2147483647, %v663_v0 }
  0x80   : > { %v665_v12 = vsub.f32 %v658_v2, %v661_v5  ;;  %v666_v53 = vsub.f32 %v658_v2, %v664_v7 }
  0x82   : > { %v667_v22 = vmul.f32 %v665_v12, %v665_v12  ;;  %v669_v23 = vmul.f32 %v666_v53, %v666_v53 }
  0x84   : > { %v668_v58 = vadd.f32 %v667_v22, %v593_v10  ;;  %v670_v29 = vadd.f32 %v669_v23, %v595_v32 }
  0x86   : > { %671 = vst [vmem:[%s369_s24] sm:$0xff] %v668_v58  ;;  %907 = vst [vmem:[%s369_s24 + $0x8] sm:$0xff] %v670_v29 }
  0x87   : > { %1060 = shalt.err (!%p1057_p8)
}
  0x88   : > { %s1061_s5 = scalar_lea.hbm %s1528_s30, 256  ;;  %s1065_s9 = scalar_lea.hbm %s1579_s3, 512 }
  0x89   : > { %p1062_p10 = scmp.ne.s32.totalorder %s1528_s30, %s1061_s5  ;;  %p1066_p1 = scmp.lt.s32.totalorder %s1528_s30, %s1579_s3 }
  0x8a   : > { %p1067_p2 = scmp.lt.s32.totalorder %s1065_s9, %s1061_s5 }
  0x8b   : > { %p1063_p13 = pnand %p1062_p10, %p1229_p9 }
  0x8c   : > { %p1068_p3 = por %p1067_p2, %p1066_p1 }
  0x8d   : > { %p1064_p0 = pneg %p1063_p13 }
  0x8f   : > { %p1069_p4 = pnand %p1068_p3, %p1064_p0 }
  0x91   : > { %1072 = shalt.err (!%p1069_p4)
}
  0x92   : > { %s1152_s18 = smov 128   ;;  %s1153_s24 = smov 8  }
  0x93   : > { %948 = dma.vmem_to_hbm [thread:$0]  (%p1229_p9), %s1523_s23, 256, %s1528_s30, %s675_s29, %s1152_s18, %s1152_s18, %s1153_s24  }
  0x94 PF: > { %s705_s4 = sand.u32 1, %s1111_s12   ;;  %p951_p5 = pnand %p859_p12, %p1236_p11 }
  0x95   : > { %s706_s19 = scalar_lea.sflag [#allocation4], %s705_s4 }
  0x96   : > { %p952_p6 = pneg %p951_p5 }
  0x98   : > { %1106 = dma.done.wait (%p952_p6), %s706_s19, 256  }
  0x99   : > { %1108 = vsyncadd (%p952_p6), %s706_s19, 4294967040  ;;  %s22_s17 = sadd.s32 1, %s1131_s17   ;;  %s1586_s12 = smov %s1115_s13 }
  0x9a   : > { %p19_p7 = scmp.ge.s32.totalorder %s22_s17, 4   ;;  %s1587_s13 = smov %s1119_s14 }
  0x9b   : > { %s1588_s14 = smov %s1234_s26  ;;  %s1589_s15 = smov %s1127_s16 }
  0x9c   : > { %s1590_s16 = smov %s1592_s20  ;;  %21 = sbr.rel (!%p19_p7) target bundleno = 10 (0xa), region = 150 }
  0xa1   :  { %711 = vsyncpa [#allocation3], 1 }
  0xa2   :  { %713 = vsyncpa [#allocation3 + $0x1], 1 }
  0xa3   :  { %714 = vsyncpa [#allocation6], 1 }
  0xa4   :  { %716 = vsyncpa [#allocation6 + $0x1], 1 }
  0xa5   :  { %717 = vsyncpa [#allocation4], 1 }
  0xa6   :  { %719 = vsyncpa [#allocation4 + $0x1], 1 }

</bundles_post_ra>
